<compile_context>
chip_gen: v7x
topology: tpu7x:2x2x1
jax: 0.10.0
libtpu: 0.0.40
codegen_flags: <defaults>
</compile_context>

<pallas_src>
import math
import functools

import jax
import jax.numpy as jnp
from jax.experimental import pallas as pl
from jax.experimental.pallas import tpu as pltpu


def _round_up(x, m):
    return ((x + m - 1) // m) * m


# ----------------------------------------------------------------------------
# Pallas kernels: tiled bf16 matmul with f32 accumulation + fused bias
# ----------------------------------------------------------------------------
def _matmul_bias_kernel(a_ref, b_ref, bias_ref, o_ref):
    # Single K step: no accumulator scratch, no init/finalize phases.
    o_ref[...] = (jnp.dot(a_ref[...], b_ref[...],
                          preferred_element_type=jnp.float32)
                  + bias_ref[...]).astype(o_ref.dtype)


def _matmul_acc_kernel(a_ref, b_ref, bias_ref, o_ref, acc_ref):
    @pl.when(pl.program_id(2) == 0)
    def _():
        acc_ref[...] = jnp.zeros(acc_ref.shape, acc_ref.dtype)

    acc_ref[...] += jnp.dot(a_ref[...], b_ref[...],
                            preferred_element_type=jnp.float32)

    @pl.when(pl.program_id(2) == pl.num_programs(2) - 1)
    def _():
        o_ref[...] = (acc_ref[...] + bias_ref[...]).astype(o_ref.dtype)


def pallas_matmul(a, b, bias=None, out_dtype=jnp.float32):
    """C = A @ B (+ bias). A:[M,K], B:[K,N] -> [M,N]. bf16 MXU, f32 accumulate."""
    M, K = a.shape
    K2, N = b.shape
    assert K == K2
    a = a.astype(jnp.bfloat16)
    b = b.astype(jnp.bfloat16)

    # M tiling: 256 when large enough that both v7x TensorCores get >=2 steps.
    if M >= 512:
        TM = 256
    elif M >= 128:
        TM = 128
    else:
        TM = _round_up(M, 8)
    Mp = _round_up(M, TM)

    # N tiling: lane-dense (128) output tiles for 32 <= N < 128 (unmasked vst);
    # keep tiny N (decoder head, N=4/16) as a full-dim block.
    if N >= 128:
        TN = 256 if (N >= 512 and N % 256 == 0) else 128
        Np = _round_up(N, TN)
    elif N >= 32:
        TN, Np = 128, 128
    else:
        TN, Np = N, N

    # K tiling: single full-K step whenever it fits (always true in this model).
    if K <= 2048:
        TK, Kp = K, K
    else:
        TK = 512
        Kp = _round_up(K, TK)

    if Mp != M or Kp != K:
        a = jnp.pad(a, ((0, Mp - M), (0, Kp - K)))
    if Kp != K or Np != N:
        b = jnp.pad(b, ((0, Kp - K), (0, Np - N)))

    if bias is None:
        bias_arr = jnp.zeros((1, Np), jnp.float32)
    else:
        bias_arr = bias.astype(jnp.float32).reshape(1, N)
        if Np != N:
            bias_arr = jnp.pad(bias_arr, ((0, 0), (0, Np - N)))

    nk = Kp // TK
    if nk == 1:
        out = pl.pallas_call(
            _matmul_bias_kernel,
            out_shape=jax.ShapeDtypeStruct((Mp, Np), out_dtype),
            grid=(Mp // TM, Np // TN),
            in_specs=[pl.BlockSpec((TM, TK), lambda i, j: (i, 0)),
                      pl.BlockSpec((TK, TN), lambda i, j: (0, j)),
                      pl.BlockSpec((1, TN), lambda i, j: (0, j))],
            out_specs=pl.BlockSpec((TM, TN), lambda i, j: (i, j)),
            compiler_params=pltpu.CompilerParams(
                dimension_semantics=("parallel", "parallel")),
        )(a, b, bias_arr)
    else:
        out = pl.pallas_call(
            _matmul_acc_kernel,
            out_shape=jax.ShapeDtypeStruct((Mp, Np), out_dtype),
            grid=(Mp // TM, Np // TN, nk),
            in_specs=[pl.BlockSpec((TM, TK), lambda i, j, k: (i, k)),
                      pl.BlockSpec((TK, TN), lambda i, j, k: (k, j)),
                      pl.BlockSpec((1, TN), lambda i, j, k: (0, j))],
            out_specs=pl.BlockSpec((TM, TN), lambda i, j, k: (i, j)),
            scratch_shapes=[pltpu.VMEM((TM, TN), jnp.float32)],
            compiler_params=pltpu.CompilerParams(
                dimension_semantics=("parallel", "parallel", "arbitrary")),
        )(a, b, bias_arr)

    if Mp != M or Np != N:
        out = out[:M, :N]
    return out


# ----------------------------------------------------------------------------
# Pallas kernel: flash-style attention (online softmax, kv-tiled)
# ----------------------------------------------------------------------------
def _flash_attn_kernel(q_ref, k_ref, v_ref, kb_ref, *refs, scale, with_pmax):
    if with_pmax:
        o_ref, p_ref, m_sc, l_sc, acc_sc = refs
    else:
        o_ref, m_sc, l_sc, acc_sc = refs
        p_ref = None
    kv = pl.program_id(2)

    @pl.when(kv == 0)
    def _():
        m_sc[...] = jnp.full(m_sc.shape, -jnp.inf, m_sc.dtype)
        l_sc[...] = jnp.zeros(l_sc.shape, l_sc.dtype)
        acc_sc[...] = jnp.zeros(acc_sc.shape, acc_sc.dtype)

    # scores: (G, TQ, TKB), bf16 q/k on MXU, f32 accumulation.  Key padding is
    # handled by a tiny additive bias row (0 on valid cols, -1e30 on padded).
    s = jax.lax.dot_general(
        q_ref[...], k_ref[...],
        (((2,), (2,)), ((0,), (0,))),
        preferred_element_type=jnp.float32) * scale
    s = s + kb_ref[...][None]

    m_prev = m_sc[...]
    m_new = jnp.maximum(m_prev, s.max(axis=-1, keepdims=True))
    alpha = jnp.exp(m_prev - m_new)
    p = jnp.exp(s - m_new)
    l_sc[...] = alpha * l_sc[...] + p.sum(axis=-1, keepdims=True)
    acc_sc[...] = alpha * acc_sc[...] + jax.lax.dot_general(
        p.astype(v_ref.dtype), v_ref[...],
        (((2,), (1,)), ((0,), (0,))),
        preferred_element_type=jnp.float32)
    m_sc[...] = m_new

    @pl.when(kv == pl.num_programs(2) - 1)
    def _():
        # exact divide (feeds flow / matching-certainty paths)
        inv_l = 1.0 / l_sc[...]
        o_ref[...] = (acc_sc[...] * inv_l).astype(o_ref.dtype)
        if with_pmax:
            # max softmax prob over a row == exp(max - max) / l == 1 / l
            p_ref[...] = inv_l


def pallas_attention(q, k, v, *, scale=None, with_pmax=False, value_bf16=True):
    """softmax(q k^T * scale) @ v per batch; optional per-row max-prob.

    q:[B,L,D], k:[B,S,D], v:[B,S,Dv].  D and Dv are streamed un-padded
    (full-dim last axis) so small head/value dims (32, 2) cost no extra HBM.
    """
    B, L, D = q.shape
    S = k.shape[1]
    Dv = v.shape[-1]
    if scale is None:
        scale = 1.0 / math.sqrt(D)

    TQ = min(128, _round_up(L, 8))
    Lp = _round_up(L, TQ)
    TKB = min(128, _round_up(S, 8))
    Sp = _round_up(S, TKB)

    # Batch several (small) windows per grid step, but keep >= 2 steps on the
    # parallel batch axis when possible so both v7x TensorCores are used.
    G = 1
    for g in (32, 16, 8, 4, 2):
        if B % g == 0 and B // g >= 2:
            G = g
            break

    q = q.astype(jnp.bfloat16)
    k = k.astype(jnp.bfloat16)
    v = v.astype(jnp.bfloat16 if value_bf16 else jnp.float32)
    if Lp != L:
        q = jnp.pad(q, ((0, 0), (0, Lp - L), (0, 0)))
    if Sp != S:
        k = jnp.pad(k, ((0, 0), (0, Sp - S), (0, 0)))
        v = jnp.pad(v, ((0, 0), (0, Sp - S), (0, 0)))
    # additive key-padding bias (constant-folded by XLA)
    kbias = jnp.where(jnp.arange(Sp) < S, 0.0, -1e30).astype(jnp.float32)[None]

    grid = (B // G, Lp // TQ, Sp // TKB)
    kernel = functools.partial(_flash_attn_kernel, scale=scale,
                               with_pmax=with_pmax)

    o_sds = jax.ShapeDtypeStruct((B, Lp, Dv), jnp.float32)
    o_spec = pl.BlockSpec((G, TQ, Dv), lambda b, i, kv: (b, i, 0))
    if with_pmax:
        out_shape = (o_sds, jax.ShapeDtypeStruct((B, Lp, 1), jnp.float32))
        out_specs = (o_spec,
                     pl.BlockSpec((G, TQ, 1), lambda b, i, kv: (b, i, 0)))
    else:
        out_shape = o_sds
        out_specs = o_spec

    res = pl.pallas_call(
        kernel,
        out_shape=out_shape,
        grid=grid,
        in_specs=[pl.BlockSpec((G, TQ, D), lambda b, i, kv: (b, i, 0)),
                  pl.BlockSpec((G, TKB, D), lambda b, i, kv: (b, kv, 0)),
                  pl.BlockSpec((G, TKB, Dv), lambda b, i, kv: (b, kv, 0)),
                  pl.BlockSpec((1, TKB), lambda b, i, kv: (0, kv))],
        out_specs=out_specs,
        scratch_shapes=[pltpu.VMEM((G, TQ, 1), jnp.float32),
                        pltpu.VMEM((G, TQ, 1), jnp.float32),
                        pltpu.VMEM((G, TQ, Dv), jnp.float32)],
        compiler_params=pltpu.CompilerParams(
            dimension_semantics=("parallel", "parallel", "arbitrary")),
    )(q, k, v, kbias)

    if with_pmax:
        out, pmax = res
        if Lp != L:
            out, pmax = out[:, :L], pmax[:, :L]
        return out, pmax
    return res[:, :L] if Lp != L else res


# ----------------------------------------------------------------------------
# Pallas kernel: final blend (tanh / sigmoid / mask blend / clamp)
# ----------------------------------------------------------------------------
def _blend_kernel(w0_ref, w1_ref, dec_ref, merged_ref, pred_ref, mask_ref):
    dec = dec_ref[0]                              # (4, TS)
    res = jnp.tanh(dec[0:3, :])
    mask = jax.nn.sigmoid(dec[3:4, :])
    merged = w0_ref[0] * mask + w1_ref[0] * (1.0 - mask)
    merged_ref[0] = merged
    pred_ref[0] = jnp.clip(merged + res, 0.0, 1.0)
    mask_ref[0] = mask


def pallas_blend(xw0, xw1, decoded):
    # TODO(synk): could be fused into the decoder's final conv epilogue to
    # avoid one full read of `decoded`.
    B, _, H, W = decoded.shape
    HW = H * W
    TS = min(8192, _round_up(HW, 128))            # lane-dense spatial tiles
    HWp = _round_up(HW, TS)

    def prep(x, c):
        x = x.reshape(B, c, HW)                   # contiguous reshape: no copy
        if HWp != HW:
            x = jnp.pad(x, ((0, 0), (0, 0), (0, HWp - HW)))
        return x.astype(jnp.float32)

    w0 = prep(xw0, 3)
    w1 = prep(xw1, 3)
    dec = prep(decoded, 4)

    merged, pred, mask = pl.pallas_call(
        _blend_kernel,
        out_shape=(jax.ShapeDtypeStruct((B, 3, HWp), jnp.float32),
                   jax.ShapeDtypeStruct((B, 3, HWp), jnp.float32),
                   jax.ShapeDtypeStruct((B, 1, HWp), jnp.float32)),
        grid=(B, HWp // TS),
        in_specs=[pl.BlockSpec((1, 3, TS), lambda b, s: (b, 0, s)),
                  pl.BlockSpec((1, 3, TS), lambda b, s: (b, 0, s)),
                  pl.BlockSpec((1, 4, TS), lambda b, s: (b, 0, s))],
        out_specs=(pl.BlockSpec((1, 3, TS), lambda b, s: (b, 0, s)),
                   pl.BlockSpec((1, 3, TS), lambda b, s: (b, 0, s)),
                   pl.BlockSpec((1, 1, TS), lambda b, s: (b, 0, s))),
        compiler_params=pltpu.CompilerParams(
            dimension_semantics=("parallel", "parallel")),
    )(w0, w1, dec)

    def unp(x, c):
        return x[:, :, :HW].reshape(B, c, H, W)

    return unp(merged, 3), unp(pred, 3), unp(mask, 1)


# ----------------------------------------------------------------------------
# Layer helpers (glue around the Pallas kernels).  Backbone/decoder internals
# are NHWC so im2col patches land directly in (B*Ho*Wo, K) without transposes.
# ----------------------------------------------------------------------------
def conv2d_nhwc(p, x, stride=1, padding=0):
    """NHWC conv = im2col patches + Pallas matmul with fused bias."""
    wm = p['wm']                                  # (Cin, kh, kw, Cout) bf16
    cin, kh, kw, cout = wm.shape
    x = x.astype(jnp.bfloat16)
    if kh == 1 and kw == 1 and padding == 0:      # 1x1 conv: no patch pass
        xs = x[:, ::stride, ::stride, :]
        B, Ho, Wo, _ = xs.shape
        out = pallas_matmul(xs.reshape(B * Ho * Wo, cin),
                            wm.reshape(cin, cout), bias=p.get('b'))
        return out.reshape(B, Ho, Wo, cout)
    # Patch features come out channel-major (cin, kh, kw) which matches the
    # (cin, kh, kw, cout) weight layout; NHWC output avoids a transpose copy.
    patches = jax.lax.conv_general_dilated_patches(
        x, (kh, kw), (stride, stride),
        [(padding, padding), (padding, padding)],
        dimension_numbers=('NHWC', 'HWIO', 'NHWC'))
    B, Ho, Wo, K = patches.shape
    out = pallas_matmul(patches.reshape(B * Ho * Wo, K),
                        wm.reshape(cin * kh * kw, cout), bias=p.get('b'))
    return out.reshape(B, Ho, Wo, cout)


def linear(p, x):
    shp = x.shape
    wt = p['wt']                                  # (din, dout) bf16
    out = pallas_matmul(x.reshape(-1, shp[-1]), wt, bias=p.get('b'))
    return out.reshape(shp[:-1] + (wt.shape[1],))


def instance_norm_nhwc(x, eps=1e-5):
    mu = x.mean(axis=(1, 2), keepdims=True)
    var = x.var(axis=(1, 2), keepdims=True)
    return (x - mu) / jnp.sqrt(var + eps)


def layer_norm(p, x, eps=1e-5):
    mu = x.mean(axis=-1, keepdims=True)
    var = x.var(axis=-1, keepdims=True)
    return (x - mu) / jnp.sqrt(var + eps) * p['g'] + p['b']


def pixel_shuffle_nhwc(x, r):
    B, H, W, C = x.shape
    Co = C // (r * r)
    x = x.reshape(B, H, W, Co, r, r)
    x = x.transpose(0, 1, 4, 2, 5, 3)
    return x.reshape(B, H * r, W * r, Co)


IMAGENET_MEAN = jnp.array([0.485, 0.456, 0.406], jnp.float32).reshape(1, 3, 1, 1)
IMAGENET_STD = jnp.array([0.229, 0.224, 0.225], jnp.float32).reshape(1, 3, 1, 1)


def normalize_imgnet(x):
    return (x / 255.0 - IMAGENET_MEAN) / IMAGENET_STD


# ----------------------------------------------------------------------------
# Backbone (GMFlow CNNEncoder) — NHWC internally, NCHW at the boundary
# ----------------------------------------------------------------------------
def res_block(p, x, stride):
    y = jax.nn.relu(instance_norm_nhwc(conv2d_nhwc(p['conv1'], x, stride, 1)))
    y = jax.nn.relu(instance_norm_nhwc(conv2d_nhwc(p['conv2'], y, 1, 1)))
    if 'down' in p:
        x = instance_norm_nhwc(conv2d_nhwc(p['down'], x, stride, 0))
    return jax.nn.relu(x + y)


def cnn_encoder(p, x):
    x = jnp.transpose(x, (0, 2, 3, 1))                             # -> NHWC
    x = jax.nn.relu(instance_norm_nhwc(conv2d_nhwc(p['conv1'], x, 2, 3)))  # 1/2
    strides = {'layer1': 1, 'layer2': 2, 'layer3': 2}
    for name in ('layer1', 'layer2', 'layer3'):
        blocks = p[name]
        x = res_block(blocks[0], x, strides[name])
        x = res_block(blocks[1], x, 1)
    x = conv2d_nhwc(p['conv2'], x, 1, 0)                           # 1/8
    return jnp.transpose(x, (0, 3, 1, 2))                          # -> NCHW


# ----------------------------------------------------------------------------
# Transformer (GMFlow FeatureTransformer, swin split attention)
# ----------------------------------------------------------------------------
def split_feature_nchw(x, ns):
    b, c, h, w = x.shape
    x = x.reshape(b, c, ns, h // ns, ns, w // ns)
    x = x.transpose(0, 2, 4, 1, 3, 5)
    return x.reshape(b * ns * ns, c, h // ns, w // ns)


def merge_splits_nchw(x, ns):
    b2, c, hs, ws = x.shape
    b = b2 // (ns * ns)
    x = x.reshape(b, ns, ns, c, hs, ws)
    x = x.transpose(0, 3, 1, 4, 2, 5)
    return x.reshape(b, c, ns * hs, ns * ws)


def position_embedding_sine(h, w, num_pos_feats, temperature=10000.0):
    scale = 2.0 * math.pi
    eps = 1e-6
    y_embed = jnp.broadcast_to(
        jnp.arange(1, h + 1, dtype=jnp.float32)[:, None], (h, w))
    x_embed = jnp.broadcast_to(
        jnp.arange(1, w + 1, dtype=jnp.float32)[None, :], (h, w))
    y_embed = y_embed / (y_embed[-1:, :] + eps) * scale
    x_embed = x_embed / (x_embed[:, -1:] + eps) * scale
    dim_t = jnp.arange(num_pos_feats, dtype=jnp.float32)
    dim_t = temperature ** (2.0 * jnp.floor(dim_t / 2.0) / num_pos_feats)
    pos_x = x_embed[:, :, None] / dim_t
    pos_y = y_embed[:, :, None] / dim_t
    pos_x = jnp.stack([jnp.sin(pos_x[:, :, 0::2]),
                       jnp.cos(pos_x[:, :, 1::2])], axis=3).reshape(h, w, -1)
    pos_y = jnp.stack([jnp.sin(pos_y[:, :, 0::2]),
                       jnp.cos(pos_y[:, :, 1::2])], axis=3).reshape(h, w, -1)
    pos = jnp.concatenate([pos_y, pos_x], axis=-1)
    return jnp.transpose(pos, (2, 0, 1))[None]


def feature_add_position(feat0, feat1, attn_splits, feature_channels):
    if attn_splits > 1:
        f0s = split_feature_nchw(feat0, attn_splits)
        f1s = split_feature_nchw(feat1, attn_splits)
        _, _, hs, ws = f0s.shape
        pos = position_embedding_sine(hs, ws, feature_channels // 2)
        f0s = f0s + pos
        f1s = f1s + pos
        feat0 = merge_splits_nchw(f0s, attn_splits)
        feat1 = merge_splits_nchw(f1s, attn_splits)
    else:
        _, _, h, w = feat0.shape
        pos = position_embedding_sine(h, w, feature_channels // 2)
        feat0 = feat0 + pos
        feat1 = feat1 + pos
    return feat0, feat1


def split_window_attention(q, k, v, num_splits, h, w):
    B, L, C = q.shape
    hs, ws = h // num_splits, w // num_splits

    def split(x):
        d = x.shape[-1]
        x = x.reshape(B, num_splits, hs, num_splits, ws, d)
        x = x.transpose(0, 1, 3, 2, 4, 5)
        return x.reshape(B * num_splits * num_splits, hs * ws, d)

    out = pallas_attention(split(q), split(k), split(v),
                           scale=1.0 / math.sqrt(C),
                           with_pmax=False, value_bf16=True)
    Dv = out.shape[-1]
    out = out.reshape(B, num_splits, num_splits, hs, ws, Dv)
    out = out.transpose(0, 1, 3, 2, 4, 5).reshape(B, h * w, Dv)
    return out


def transformer_layer(p, source, target, h, w, num_splits, no_ffn):
    if 'qkv' in p:                           # self-attention: target is source
        q, k, v = jnp.split(linear(p['qkv'], source), 3, axis=-1)
    else:                                    # cross-attention: fused k/v only
        q = linear(p['q'], source)
        k, v = jnp.split(linear(p['kv'], target), 2, axis=-1)
    message = split_window_attention(q, k, v, num_splits, h, w)
    message = linear(p['merge'], message)
    message = layer_norm(p['norm1'], message)
    if not no_ffn:
        y = jnp.concatenate([source, message], axis=-1)
        y = linear(p['mlp0'], y)
        y = jax.nn.gelu(y, approximate=False)
        y = linear(p['mlp1'], y)
        message = layer_norm(p['norm2'], y)
    return source + message


def feature_transformer(p, feat0, feat1, attn_num_splits):
    b, c, h, w = feat0.shape
    f0 = feat0.reshape(b, c, h * w).transpose(0, 2, 1)
    f1 = feat1.reshape(b, c, h * w).transpose(0, 2, 1)
    concat0 = jnp.concatenate([f0, f1], axis=0)
    concat1 = jnp.concatenate([f1, f0], axis=0)
    # TODO(synk): shifted-window attention mask for odd-index layers not
    # implemented (demo uses nlayer=1 where GMFlow uses with_shift=False).
    for lp in p['layers']:
        concat0 = transformer_layer(lp['self'], concat0, concat0,
                                    h, w, attn_num_splits, True)
        concat0 = transformer_layer(lp['cross'], concat0, concat1,
                                    h, w, attn_num_splits, False)
        c0a, c0b = jnp.split(concat0, 2, axis=0)
        concat1 = jnp.concatenate([c0b, c0a], axis=0)
    f0o, f1o = jnp.split(concat0, 2, axis=0)
    feat0 = f0o.transpose(0, 2, 1).reshape(b, c, h, w)
    feat1 = f1o.transpose(0, 2, 1).reshape(b, c, h, w)
    return feat0, feat1


# ----------------------------------------------------------------------------
# Flow estimation pieces
# ----------------------------------------------------------------------------
def coords_grid_flat(h, w):
    ys, xs = jnp.meshgrid(jnp.arange(h, dtype=jnp.float32),
                          jnp.arange(w, dtype=jnp.float32), indexing='ij')
    return jnp.stack([xs, ys], axis=-1).reshape(h * w, 2)   # (x, y)


def global_correlation_softmax_bidir(feat0, feat1):
    b, c, h, w = feat0.shape
    f0 = feat0.reshape(b, c, h * w).transpose(0, 2, 1)
    f1 = feat1.reshape(b, c, h * w).transpose(0, 2, 1)
    q = jnp.concatenate([f0, f1], axis=0)
    k = jnp.concatenate([f1, f0], axis=0)
    grid = coords_grid_flat(h, w)
    v = jnp.broadcast_to(grid[None], (2 * b, h * w, 2))
    corresp, pmax = pallas_attention(q, k, v, scale=1.0 / math.sqrt(c),
                                     with_pmax=True, value_bf16=False)
    corresp = corresp.reshape(2 * b, h, w, 2).transpose(0, 3, 1, 2)
    init_grid = grid.reshape(h, w, 2).transpose(2, 0, 1)[None]
    flow = corresp - init_grid
    maxprob = pmax[..., 0].reshape(2 * b, 1, h, w)
    return flow, maxprob


def self_attn_propagation(p, feature, flow):
    b, c, h, w = feature.shape
    x = feature.reshape(b, c, h * w).transpose(0, 2, 1)
    q, k = jnp.split(linear(p['qk'], x), 2, axis=-1)      # fused q/k proj
    v = flow.reshape(b, flow.shape[1], h * w).transpose(0, 2, 1)
    out = pallas_attention(q, k, v, scale=1.0 / math.sqrt(c),
                           with_pmax=False, value_bf16=False)
    return out.reshape(b, h, w, flow.shape[1]).transpose(0, 3, 1, 2)


# ----------------------------------------------------------------------------
# Warping / resampling (plain JAX glue — scatter/gather)
# ----------------------------------------------------------------------------
def upsample_bilinear_align(x, scale):
    B, C, H, W = x.shape
    Ho, Wo = H * scale, W * scale
    yo = jnp.arange(Ho, dtype=jnp.float32) * (H - 1) / (Ho - 1)
    xo = jnp.arange(Wo, dtype=jnp.float32) * (W - 1) / (Wo - 1)
    y0 = jnp.floor(yo).astype(jnp.int32)
    x0 = jnp.floor(xo).astype(jnp.int32)
    y1 = jnp.minimum(y0 + 1, H - 1)
    x1 = jnp.minimum(x0 + 1, W - 1)
    wy = (yo - y0.astype(jnp.float32))[:, None]
    wx = (xo - x0.astype(jnp.float32))[None, :]
    v00 = x[:, :, y0[:, None], x0[None, :]]
    v01 = x[:, :, y0[:, None], x1[None, :]]
    v10 = x[:, :, y1[:, None], x0[None, :]]
    v11 = x[:, :, y1[:, None], x1[None, :]]
    return (v00 * (1 - wy) * (1 - wx) + v01 * (1 - wy) * wx +
            v10 * wy * (1 - wx) + v11 * wy * wx)


def backward_warp(feat, flow):
    """Bilinear backward warp (grid_sample, zero padding, align_corners)."""
    B, C, H, W = feat.shape
    gy, gx = jnp.meshgrid(jnp.arange(H, dtype=jnp.float32),
                          jnp.arange(W, dtype=jnp.float32), indexing='ij')
    sx = gx[None] + flow[:, 0]
    sy = gy[None] + flow[:, 1]
    x0 = jnp.floor(sx)
    y0 = jnp.floor(sy)
    x1 = x0 + 1
    y1 = y0 + 1
    ff = feat.reshape(B, C, H * W)

    def gather(xi, yi):
        valid = (xi >= 0) & (xi <= W - 1) & (yi >= 0) & (yi <= H - 1)
        xi_c = jnp.clip(xi, 0, W - 1).astype(jnp.int32)
        yi_c = jnp.clip(yi, 0, H - 1).astype(jnp.int32)
        idx = (yi_c * W + xi_c).reshape(B, H * W)
        vals = jax.vmap(lambda f, i: f[:, i])(ff, idx)
        return vals * valid.reshape(B, 1, H * W)

    w00 = ((x1 - sx) * (y1 - sy)).reshape(B, 1, H * W)
    w10 = ((sx - x0) * (y1 - sy)).reshape(B, 1, H * W)
    w01 = ((x1 - sx) * (sy - y0)).reshape(B, 1, H * W)
    w11 = ((sx - x0) * (sy - y0)).reshape(B, 1, H * W)
    out = (gather(x0, y0) * w00 + gather(x1, y0) * w10 +
           gather(x0, y1) * w01 + gather(x1, y1) * w11)
    return out.reshape(B, C, H, W)


def soft_splat(inp, flow, metric):
    """Softmax splatting (forward warp with exp(metric) weights)."""
    # TODO(synk): scatter-add forward warping has no clean Pallas TPU
    # equivalent; implemented with jnp scatter-add glue.
    B, C, H, W = inp.shape
    wgt = jnp.exp(metric)
    src = jnp.concatenate([inp * wgt, wgt], axis=1).reshape(B, C + 1, H * W)
    gy, gx = jnp.meshgrid(jnp.arange(H, dtype=jnp.float32),
                          jnp.arange(W, dtype=jnp.float32), indexing='ij')
    tx = gx[None] + flow[:, 0]
    ty = gy[None] + flow[:, 1]
    x0 = jnp.floor(tx)
    y0 = jnp.floor(ty)
    x1 = x0 + 1
    y1 = y0 + 1
    out = jnp.zeros((B, C + 1, H * W), jnp.float32)

    def scatter_one(out, xi, yi, w):
        valid = (xi >= 0) & (xi <= W - 1) & (yi >= 0) & (yi <= H - 1)
        idx = (jnp.clip(yi, 0, H - 1).astype(jnp.int32) * W +
               jnp.clip(xi, 0, W - 1).astype(jnp.int32)).reshape(B, H * W)
        wv = (w * valid).reshape(B, 1, H * W)
        vals = src * wv
        return jax.vmap(lambda o, i, v: o.at[:, i].add(v))(out, idx, vals)

    out = scatter_one(out, x0, y0, (x1 - tx) * (y1 - ty))
    out = scatter_one(out, x1, y0, (tx - x0) * (y1 - ty))
    out = scatter_one(out, x0, y1, (x1 - tx) * (ty - y0))
    out = scatter_one(out, x1, y1, (tx - x0) * (ty - y0))
    out = out.reshape(B, C + 1, H, W)
    return out[:, :C] / (out[:, C:] + 1e-7)


# ----------------------------------------------------------------------------
# Decoder (NHWC internally)
# ----------------------------------------------------------------------------
def run_decoder(p, x):
    x = jnp.transpose(x, (0, 2, 3, 1))                     # -> NHWC
    x = pixel_shuffle_nhwc(conv2d_nhwc(p['c0'], x, 1, 1), 2)
    x = pixel_shuffle_nhwc(conv2d_nhwc(p['c1'], x, 1, 1), 2)
    x = pixel_shuffle_nhwc(conv2d_nhwc(p['c2'], x, 1, 1), 2)
    x = jax.nn.leaky_relu(conv2d_nhwc(p['c3'], x, 1, 1), 0.2)
    x = conv2d_nhwc(p['c4'], x, 1, 1)
    return jnp.transpose(x, (0, 3, 1, 2))                  # -> NCHW


# ----------------------------------------------------------------------------
# Parameter initialization (deterministic, synthetic)
# ----------------------------------------------------------------------------
class KeyGen:
    def __init__(self, seed):
        self.key = jax.random.PRNGKey(seed)
        self.i = 0

    def __call__(self):
        self.i += 1
        return jax.random.fold_in(self.key, self.i)


def _uniform(key, shape, bound):
    return jax.random.uniform(key, shape, jnp.float32, -bound, bound)


def conv_p(kg, cin, cout, k, bias=True):
    bound = 1.0 / math.sqrt(cin * k * k)
    w = _uniform(kg(), (cout, cin, k, k), bound)
    # pre-transpose + pre-cast to bf16 at init: (Cin, kh, kw, Cout)
    p = {'wm': jnp.transpose(w, (1, 2, 3, 0)).astype(jnp.bfloat16)}
    p['b'] = _uniform(kg(), (cout,), bound) if bias else None
    return p


def linear_p(kg, din, dout, bias=True):
    bound = 1.0 / math.sqrt(din)
    w = _uniform(kg(), (dout, din), bound)
    p = {'wt': w.T.astype(jnp.bfloat16)}          # pre-transposed (din, dout)
    p['b'] = _uniform(kg(), (dout,), bound) if bias else None
    return p


def ln_p(dim):
    return {'g': jnp.ones((dim,), jnp.float32),
            'b': jnp.zeros((dim,), jnp.float32)}


def init_params(seed, nf, nlayer, ffn_exp, init_alpha):
    kg = KeyGen(seed)
    dims = [64, 96, 128]            # GMFlow CNNEncoder internal dims

    def block(cin, cout, down):
        bp = {'conv1': conv_p(kg, cin, cout, 3, bias=False),
              'conv2': conv_p(kg, cout, cout, 3, bias=False)}
        if down:
            bp['down'] = conv_p(kg, cin, cout, 1, bias=True)
        return bp

    backbone = {
        'conv1': conv_p(kg, 3, dims[0], 7, bias=False),
        'layer1': [block(dims[0], dims[0], False), block(dims[0], dims[0], False)],
        'layer2': [block(dims[0], dims[1], True), block(dims[1], dims[1], False)],
        'layer3': [block(dims[1], dims[2], True), block(dims[2], dims[2], False)],
        'conv2': conv_p(kg, dims[2], nf, 1, bias=True),
    }

    def tlayer(no_ffn):
        d = {'merge': linear_p(kg, nf, nf), 'norm1': ln_p(nf)}
        if no_ffn:                                 # self-attn layer: fused qkv
            d['qkv'] = linear_p(kg, nf, 3 * nf)
        else:                                      # cross-attn layer: fused kv
            d['q'] = linear_p(kg, nf, nf)
            d['kv'] = linear_p(kg, nf, 2 * nf)
            d['mlp0'] = linear_p(kg, 2 * nf, 2 * nf * ffn_exp, bias=False)
            d['mlp1'] = linear_p(kg, 2 * nf * ffn_exp, nf, bias=False)
            d['norm2'] = ln_p(nf)
        return d

    transformer = {'layers': [{'self': tlayer(True), 'cross': tlayer(False)}
                              for _ in range(nlayer)]}

    flow_attn = {'qk': linear_p(kg, nf, 2 * nf)}   # fused q/k projection

    decoder = {
        'c0': conv_p(kg, nf * 4, nf * 4, 3),
        'c1': conv_p(kg, nf, nf * 4, 3),
        'c2': conv_p(kg, nf, nf * 4, 3),
        'c3': conv_p(kg, nf, nf // 2, 3),
        'c4': conv_p(kg, nf // 2, 4, 3),
    }

    return {'backbone': backbone, 'transformer': transformer,
            'flow_attn': flow_attn, 'decoder': decoder,
            'alpha': jnp.array([init_alpha], jnp.float32)}


# ----------------------------------------------------------------------------
# Full forward (mirrors GMVFIFormerV1.forward)
# ----------------------------------------------------------------------------
def forward(params, x0, x1, t, nf):
    t = t[..., None, None]                                   # [B,1,1,1]
    x0n = normalize_imgnet(x0)
    x1n = normalize_imgnet(x1)

    # extract_cnn_feature
    concat = jnp.concatenate([x0n, x1n], axis=0)
    feats = cnn_encoder(params['backbone'], concat)
    org_feat0, org_feat1 = jnp.split(feats, 2, axis=0)

    # get_cross_attended_feature
    f0p, f1p = feature_add_position(org_feat0, org_feat1, 2, nf)
    feat0, feat1 = feature_transformer(params['transformer'], f0p, f1p, 2)

    # get_reversed_flow
    corr_flow, maxprob = global_correlation_softmax_bidir(feat0, feat1)
    matching_certainty = maxprob + 1e-6
    x0_cert, x1_cert = jnp.split(matching_certainty, 2, axis=0)
    alpha = params['alpha']
    z0 = x0_cert * alpha
    z1 = x1_cert * alpha

    feats_cat = jnp.concatenate([feat0, feat1], axis=0)
    flow_preds = self_attn_propagation(params['flow_attn'], feats_cat, corr_flow)
    f01, f10 = jnp.split(flow_preds, 2, axis=0)

    # TODO(synk): args.warp_mode is not consumed by the reference forward;
    # SoftSplat implemented in 'soft' (exp-metric) mode.
    ft0 = -soft_splat(f01, f01 * t, z0) * t
    ft1 = -soft_splat(f10, f10 * (1.0 - t), z1) * (1.0 - t)

    up_flow = upsample_bilinear_align(flow_preds, 8) * 8.0
    f01_up, f10_up = jnp.split(up_flow, 2, axis=0)

    # backward warp features to time t
    feat_t_from_0 = backward_warp(org_feat0, ft0)
    feat_t_from_1 = backward_warp(org_feat1, ft1)

    decoder_inp = jnp.concatenate(
        [feat0, feat_t_from_0, feat_t_from_1, feat1], axis=1)
    decoded = run_decoder(params['decoder'], decoder_inp)

    z0_up = upsample_bilinear_align(z0, 8)
    z1_up = upsample_bilinear_align(z1, 8)
    xt_warp_x0 = soft_splat(x0 / 255.0, f01_up * t, z0_up)
    xt_warp_x1 = soft_splat(x1 / 255.0, f10_up * (1.0 - t), z1_up)

    merged, pred, mask = pallas_blend(xt_warp_x0, xt_warp_x1, decoded)

    return {'frame_preds': [merged, pred],
            'f01': f01_up, 'f10': f10_up,
            'xt_warp_x0': xt_warp_x0, 'xt_warp_x1': xt_warp_x1,
            'x0_mask': mask, 'x1_mask': 1.0 - mask}


# ----------------------------------------------------------------------------
if __name__ == "__main__":
    NF = 32           # args.nf
    NLAYER = 1        # args.nlayer
    FFN_EXP = 2       # args.ffc_expansion
    INIT_ALPHA = 1.0  # args.init_alpha
    B, H, W = 1, 32, 32

    # One-off patch-ordering check: Pallas im2col conv vs XLA conv (both bf16
    # inputs/weights, f32 accumulation, so only accumulation order differs).
    ckg = KeyGen(7)
    cx = jax.random.normal(jax.random.PRNGKey(1), (1, 6, 9, 10), jnp.float32)
    cp = conv_p(ckg, 6, 8, 3, bias=True)
    ours = conv2d_nhwc(cp, jnp.transpose(cx, (0, 2, 3, 1)), 1, 1)
    ours = jnp.transpose(ours, (0, 3, 1, 2))
    ref = jax.lax.conv_general_dilated(
        cx.astype(jnp.bfloat16), jnp.transpose(cp['wm'], (3, 0, 1, 2)),
        (1, 1), [(1, 1), (1, 1)],
        dimension_numbers=('NCHW', 'OIHW', 'NCHW'),
        preferred_element_type=jnp.float32) + cp['b'][None, :, None, None]
    conv_err = float(jnp.max(jnp.abs(ours - ref)))
    assert conv_err < 5e-2, f"conv patch-ordering check failed: {conv_err}"

    params = init_params(0, NF, NLAYER, FFN_EXP, INIT_ALPHA)

    k0, k1 = jax.random.split(jax.random.PRNGKey(0))
    x0 = jax.random.uniform(k0, (B, 3, H, W), jnp.float32, 0.0, 255.0)
    x1 = jax.random.uniform(k1, (B, 3, H, W), jnp.float32, 0.0, 255.0)
    t = jnp.full((B, 1), 0.5, jnp.float32)

    fwd = jax.jit(functools.partial(forward, nf=NF))
    out = fwd(params, x0, x1, t)
    jax.block_until_ready(out)

    assert out['frame_preds'][1].shape == (B, 3, H, W)
    assert out['f01'].shape == (B, 2, H, W)
    assert out['x0_mask'].shape == (B, 1, H, W)
    assert bool(jnp.all(jnp.isfinite(out['frame_preds'][1])))
    print("KERNEL_OK")
</pallas_src>

<mosaic_0001>
module attributes {stable_mosaic.version = 11 : i64} {
  func.func @_matmul_bias_kernel(%arg0: i32, %arg1: i32, %arg2: memref<96x54xbf16, #tpu.memory_space<vmem>>, %arg3: memref<54x8xbf16, #tpu.memory_space<vmem>>, %arg4: memref<1x8xf32, #tpu.memory_space<vmem>>, %arg5: memref<96x8xf32, #tpu.memory_space<vmem>>) attributes {dimension_semantics = [#tpu.dimension_semantics<parallel>, #tpu.dimension_semantics<parallel>], iteration_bounds = array<i64: 1, 1>, scalar_prefetch = 0 : i64, scratch_operands = 0 : i64, tpu.core_type = #tpu.core_type<tc>, window_params = [{transform_indices = @transform_0, window_bounds = array<i64: 96, 54>}, {transform_indices = @transform_1, window_bounds = array<i64: 54, 8>}, {transform_indices = @transform_2, window_bounds = array<i64: 1, 8>}, {transform_indices = @transform_3, window_bounds = array<i64: 96, 8>}]} {
    %c0 = arith.constant 0 : index
    %c0_0 = arith.constant 0 : index
    %0 = vector.load %arg2[%c0, %c0_0] : memref<96x54xbf16, #tpu.memory_space<vmem>>, vector<96x54xbf16>
    %c0_1 = arith.constant 0 : index
    %c0_2 = arith.constant 0 : index
    %1 = vector.load %arg3[%c0_1, %c0_2] : memref<54x8xbf16, #tpu.memory_space<vmem>>, vector<54x8xbf16>
    %cst = arith.constant dense<0.000000e+00> : vector<96x8xf32>
    %2 = tpu.matmul %0, %1, %cst {dimension_numbers = #tpu.dot_dimension_numbers<[1], [0], [0], [1], [0, 0, 1, 1], [], []>} : vector<96x54xbf16>, vector<54x8xbf16>, vector<96x8xf32> -> vector<96x8xf32>
    %c0_3 = arith.constant 0 : index
    %c0_4 = arith.constant 0 : index
    %3 = vector.load %arg4[%c0_3, %c0_4] : memref<1x8xf32, #tpu.memory_space<vmem>>, vector<1x8xf32>
    %4 = vector.broadcast %3 : vector<1x8xf32> to vector<96x8xf32>
    %5 = arith.addf %2, %4 : vector<96x8xf32>
    %c0_5 = arith.constant 0 : index
    %c0_6 = arith.constant 0 : index
    %6 = vector.load %arg5[%c0_5, %c0_6] : memref<96x8xf32, #tpu.memory_space<vmem>>, vector<96x8xf32>
    tpu.vector_store %arg5[%c0_5, %c0_6], %5 {strides = array<i32>} : memref<96x8xf32, #tpu.memory_space<vmem>>, vector<96x8xf32>,
    return
  }
  func.func @transform_0(%arg0: i32, %arg1: i32) -> (i32, i32) {
    %c0_i32 = arith.constant 0 : i32
    %c0_i32_0 = arith.constant 0 : i32
    return %arg0, %c0_i32 : i32, i32
  }
  func.func @transform_1(%arg0: i32, %arg1: i32) -> (i32, i32) {
    %c0_i32 = arith.constant 0 : i32
    %c0_i32_0 = arith.constant 0 : i32
    return %c0_i32, %arg1 : i32, i32
  }
  func.func @transform_2(%arg0: i32, %arg1: i32) -> (i32, i32) {
    %c0_i32 = arith.constant 0 : i32
    %c0_i32_0 = arith.constant 0 : i32
    return %c0_i32, %arg1 : i32, i32
  }
  func.func @transform_3(%arg0: i32, %arg1: i32) -> (i32, i32) {
    %c0_i32 = arith.constant 0 : i32
    return %arg0, %arg1 : i32, i32
  }
}

</mosaic_0001>

<bundles_post_ra>
// kernel: tpu_custom_call.1
= control target key start
LH: loop header
LB: loop body
LE: loop exit
PB: predicated region body
PF: predicated region fallthrough
CT: control target
= control target key end

     0   :  { %vm92_vm0 = vcmask 441344   ;;  %vm111_vm1 = vcmask 1042432   ;;  %vm196_vm2 = vcmask 64512   ;;  %s387_s1 = inlined_call_operand.vmem [shape: bf16[54,8], index: 1, kind: input, shape index: {}]   ;;  %s388_s0 = inlined_call_operand.vmem [shape: bf16[96,54], index: 0, kind: input, shape index: {}]   ;;  %s389_s2 = inlined_call_operand.vmem [shape: f32[1,8], index: 2, kind: input, shape index: {}]   ;;  %s390_s3 = inlined_call_operand.vmem [shape: f32[96,8], index: 3, kind: output, shape index: {}]  }
   0x1   :  { %v270_v0 = vld [vmem:[%s387_s1] sm:$0xff]   ;;  %v271_v1 = vld [vmem:[%s387_s1 + $0x8] sm:$0xff]   ;;  %v272_v2 = vld [vmem:[%s387_s1 + $0x10] sm:$0xff]  }
   0x2   :  { %260 = vmatprep.subr.bf16.mxu1 %v270_v0  ;;  %240 = vmatprep.subr.bf16.mxu0 %v270_v0  ;;  %v274_v3 = vld [vmem:[%s388_s0 + $0x10] sm:$0xff]   ;;  %v273_v4 = vld [vmem:[%s387_s1 + $0x18] ss:$0 sps:$4 sm:$0x77]   ;;  %v276_v5 = vld [vmem:[%s388_s0] sm:$0xff]  }
   0x3   :  { %264 = vmatpush3.bf16.msra.mxu1 %v270_v0  ;;  %241 = vmatpush3.bf16.msra.mxu0 %v270_v0  ;;  %v113_v6 = vsel %vm111_vm1, %v273_v4, 0  ;;  %v275_v7 = vld [vmem:[%s388_s0 + $0x18] sm:$0xff]   ;;  %v277_v8 = vld [vmem:[%s388_s0 + $0x8] sm:$0xff]   ;;  %v278_v9 = vld [vmem:[%s388_s0 + $0x20] sm:$0xff]  }
   0x4   :  { %261 = vmatprep.subr.bf16.mxu1 %v271_v1  ;;  %242 = vmatprep.subr.bf16.mxu0 %v271_v1  ;;  %v279_v10 = vld [vmem:[%s388_s0 + $0x28] sm:$0xff]   ;;  %v213_v11 = vld [vmem:[%s389_s2] ss:$0 sm:$0xff] }
   0x5   :  { %252 = vmatprep.mubr.msk.bf16.mxu1 %vm92_vm0, %v274_v3  ;;  %248 = vmatprep.mubr.msk.bf16.mxu0 %vm92_vm0, %v276_v5 }
   0x7   :  { %265 = vmatpush3.bf16.msra.mxu1 %v271_v1  ;;  %243 = vmatpush3.bf16.msra.mxu0 %v271_v1 }
   0x8   :  { %262 = vmatprep.subr.bf16.mxu1 %v272_v2  ;;  %244 = vmatprep.subr.bf16.mxu0 %v272_v2 }
   0xb   :  { %266 = vmatpush3.bf16.msra.mxu1 %v272_v2  ;;  %245 = vmatpush3.bf16.msra.mxu0 %v272_v2 }
   0xc   :  { %269 = vmatprep.subr.msk.bf16.mxu1 %vm111_vm1, %v273_v4  ;;  %268 = vmatprep.subr.msk.bf16.mxu0 %vm111_vm1, %v273_v4 }
   0xf   :  { %267 = vmatpush3.bf16.msra.mxu1 %v113_v6  ;;  %247 = vmatpush3.bf16.msra.mxu0 %v113_v6 }
  0x12   :  { %253 = vmatmul.mubr.msk.bf16.vlgmr.msra.gmra.mrb[0].mxu1 %vm92_vm0, %v275_v7  ;;  %249 = vmatmul.mubr.msk.bf16.vlgmr.msra.gmra.mrb[0].mxu0 %vm92_vm0, %v277_v8 }
  0x13   :  { %256 = vmatprep.mubr.msk.bf16.mxu1 %vm92_vm0, %v278_v9 }
  0x1a   :  { %257 = vmatmul.mubr.msk.bf16.gmra.mrb[4].mxu1 %vm92_vm0, %v279_v10 }
  0xe5   :  { %v254_v12 = vpop.f32.mrb[0].mxu1  ;;  %v250_v13 = vpop.f32.mrb[0].mxu0 }
  0xe6   :  { %v174_v14 = vadd.f32 %v254_v12, %v213_v11  ;;  %v165_v15 = vpop.f32.mrb[1].mxu1  ;;  %v158_v16 = vadd.f32 %v250_v13, %v213_v11  ;;  %v149_v17 = vpop.f32.mrb[1].mxu0 }
  0xe7   :  { %v166_v18 = vadd.f32 %v213_v11, %v165_v15  ;;  %v255_v19 = vpop.f32.mrb[2].mxu1  ;;  %v150_v20 = vadd.f32 %v213_v11, %v149_v17  ;;  %v251_v21 = vpop.f32.mrb[2].mxu0 }
  0xe8   :  { %203 = vst.msk [vmem:[%s390_s3 + $0x30] sm:$0xff] %vm196_vm2, %v174_v14  ;;  %v177_v22 = vadd.f32 %v255_v19, %v213_v11  ;;  %v168_v23 = vpop.f32.mrb[3].mxu1  ;;  %199 = vst.msk [vmem:[%s390_s3 + $0x10] sm:$0xff] %vm196_vm2, %v158_v16  ;;  %v161_v24 = vadd.f32 %v251_v21, %v213_v11  ;;  %v152_v25 = vpop.f32.mrb[3].mxu0 }
  0xe9   :  { %201 = vst.msk [vmem:[%s390_s3 + $0x20] sm:$0xff] %vm196_vm2, %v166_v18  ;;  %v169_v26 = vadd.f32 %v213_v11, %v168_v23  ;;  %197 = vst.msk [vmem:[%s390_s3] sm:$0xff] %vm196_vm2, %v150_v20  ;;  %v153_v27 = vadd.f32 %v213_v11, %v152_v25 }
  0xea   :  { %204 = vst.msk [vmem:[%s390_s3 + $0x38] sm:$0xff] %vm196_vm2, %v177_v22  ;;  %200 = vst.msk [vmem:[%s390_s3 + $0x18] sm:$0xff] %vm196_vm2, %v161_v24 }
  0xeb   :  { %202 = vst.msk [vmem:[%s390_s3 + $0x28] sm:$0xff] %vm196_vm2, %v169_v26  ;;  %198 = vst.msk [vmem:[%s390_s3 + $0x8] sm:$0xff] %vm196_vm2, %v153_v27 }
  0xed   :  { %v258_v28 = vpop.f32.mrb[4].mxu1 }
  0xee   :  { %v190_v29 = vadd.f32 %v258_v28, %v213_v11  ;;  %v181_v30 = vpop.f32.mrb[5].mxu1 }
  0xef   :  { %v182_v31 = vadd.f32 %v213_v11, %v181_v30  ;;  %v259_v32 = vpop.f32.mrb[6].mxu1 }
  0xf0   :  { %207 = vst.msk [vmem:[%s390_s3 + $0x50] sm:$0xff] %vm196_vm2, %v190_v29  ;;  %v193_v33 = vadd.f32 %v259_v32, %v213_v11  ;;  %v184_v34 = vpop.f32.mrb[7].mxu1 }
  0xf1   :  { %205 = vst.msk [vmem:[%s390_s3 + $0x40] sm:$0xff] %vm196_vm2, %v182_v31  ;;  %v185_v35 = vadd.f32 %v213_v11, %v184_v34 }
  0xf2   :  { %208 = vst.msk [vmem:[%s390_s3 + $0x58] sm:$0xff] %vm196_vm2, %v193_v33 }
  0xf3   :  { %206 = vst.msk [vmem:[%s390_s3 + $0x48] sm:$0xff] %vm196_vm2, %v185_v35 }

</bundles_post_ra>
